<compile_context>
chip_gen: v7x
topology: tpu7x:2x2x1
jax: 0.10.0
libtpu: 0.0.40
codegen_flags: <defaults>
</compile_context>

<pallas_src>
import jax
import jax.numpy as jnp
from jax import lax
from jax.experimental import pallas as pl
from jax.experimental.pallas import tpu as pltpu

# ---- hyperparameters (small, consistent with the module) -------------------
WORD_SIZE = 32      # encoder token / EDU embedding size
HIDDEN_SIZE = 32    # bilinear-attention hidden size
BATCH_SIZE = 2
CHUNK_SIZE = 8
DOC_LEN = 16
E_NUM = 7           # number of EDU positions selected per document
N = E_NUM + 1       # +1 for the root hidden state
VOCAB = 50

# ---- const slab layout (width = WORD_SIZE, every block sublane(8)-aligned) --
_R_ROOT = 0                                         # rows [0, B)      root_hidden
_R_EMB = BATCH_SIZE                                 # rows [B, B+V)    embedding
_R_WE = ((BATCH_SIZE + VOCAB + 7) // 8) * 8         # rows [.., +W)    We^T
_R_WDU = _R_WE + WORD_SIZE                          # rows [.., +W)    Wd^T @ U
_R_BE = _R_WDU + WORD_SIZE                          # 1 row            be
_R_BDU = _R_BE + 8                                  # 1 row            bd @ U
_R_GAMMA = _R_BDU + 8                               # 1 row            LN gamma
_R_BETA = _R_GAMMA + 8                              # 1 row            LN beta
_SLAB_ROWS = _R_BETA + 8                            # = 152


# ---------------------------------------------------------------------------
# Pallas kernel: in-kernel gather + LayerNorm + bilinear attention + mask
# + log_softmax for the whole batch in one invocation.
# ---------------------------------------------------------------------------
def dtcp_kernel(words_ref, cls_ref, mask_ref, slab_ref, out_ref, xg_ref):
    # words_ref : (B, DOC_LEN) int32 SMEM  (scalar prefetch) token ids
    # cls_ref   : (B, E_NUM)   int32 SMEM  (scalar prefetch) EDU positions
    # mask_ref  : (B, N)       f32   VMEM  target mask over encoder axis
    # slab_ref  : (152, 32)    f32   VMEM  root | emb | We | WdU | be | bdU | g | b
    # out_ref   : (B, N, N)    f32         log-softmax dependency scores
    # xg_ref    : (B*N, W)     f32   VMEM  scratch: stacked gathered rows

    # --- in-kernel gather: root row + selected EDU token-embedding rows -----
    for b in range(BATCH_SIZE):
        r0 = b * N
        xg_ref[r0:r0 + 1, :] = slab_ref[_R_ROOT + b:_R_ROOT + b + 1, :]
        for j in range(E_NUM):
            tok_pos = cls_ref[b, j]                   # scalar (SMEM)
            word_id = words_ref[b, tok_pos]           # scalar (SMEM, dyn index)
            row = _R_EMB + word_id                    # dynamic slab row
            xg_ref[r0 + 1 + j:r0 + 2 + j, :] = slab_ref[pl.ds(row, 1), :]

    x = xg_ref[...]                                   # (B*N, W) = (16, 32)

    we = slab_ref[_R_WE:_R_WE + WORD_SIZE, :]         # (W, H)
    wdu = slab_ref[_R_WDU:_R_WDU + WORD_SIZE, :]      # (W, H)   U folded in
    be = slab_ref[_R_BE:_R_BE + 1, :]                 # (1, H)
    bdu = slab_ref[_R_BDU:_R_BDU + 1, :]              # (1, H)
    gamma = slab_ref[_R_GAMMA:_R_GAMMA + 1, :]        # (1, W)
    beta = slab_ref[_R_BETA:_R_BETA + 1, :]           # (1, W)

    # --- LayerNorm over WORD_SIZE, eps = 1e-5 (torch: biased variance) ------
    mean = jnp.mean(x, axis=-1, keepdims=True)
    xc = x - mean
    var = jnp.mean(xc * xc, axis=-1, keepdims=True)
    xn = xc * lax.rsqrt(var + 1e-5) * gamma + beta    # (B*N, W)

    # --- batch-stacked BiLinearAttention projections (U folded into d) ------
    e = jnp.dot(xn, we, preferred_element_type=jnp.float32) + be      # (B*N, H)
    du = jnp.dot(xn, wdu, preferred_element_type=jnp.float32) + bdu   # (B*N, H)

    # --- per-batch score + mask + log_softmax (8-aligned sublane slices) ----
    for b in range(BATCH_SIZE):
        e_b = e[b * N:(b + 1) * N, :]                 # (N, H)
        du_b = du[b * N:(b + 1) * N, :]               # (N, H)
        # du_b @ e_b^T without materializing a transpose
        attn = lax.dot_general(du_b, e_b, (((1,), (1,)), ((), ())),
                               preferred_element_type=jnp.float32)    # (N, N)

        m = mask_ref[b:b + 1, :]                      # (1, N) -> mask columns
        attn = jnp.where(m == 0.0, jnp.float32(-100000000.0), attn)

        mx = jnp.max(attn, axis=-1, keepdims=True)
        lse = mx + jnp.log(jnp.sum(jnp.exp(attn - mx), axis=-1, keepdims=True))
        out_ref[b] = attn - lse


# ---------------------------------------------------------------------------
# Wrapper: a single pallas_call, no surrounding XLA ops on the dynamic path.
# ---------------------------------------------------------------------------
def dtcp_forward(in_words, in_words_cls, target_mask, const_slab):
    # TODO(synk): the external `model(tmp_chunk)[0]` transformer encoder is not
    # part of DTCP; it is stubbed as an embedding lookup and folded into the
    # kernel gather. With a real contextual encoder this fold is invalid.
    return pl.pallas_call(
        dtcp_kernel,
        out_shape=jax.ShapeDtypeStruct((BATCH_SIZE, N, N), jnp.float32),
        grid_spec=pltpu.PrefetchScalarGridSpec(
            num_scalar_prefetch=2,
            grid=(1,),
            in_specs=[
                pl.BlockSpec((BATCH_SIZE, N), lambda i, w, c: (0, 0)),        # mask
                pl.BlockSpec((_SLAB_ROWS, WORD_SIZE), lambda i, w, c: (0, 0)),  # consts
            ],
            out_specs=pl.BlockSpec((BATCH_SIZE, N, N), lambda i, w, c: (0, 0, 0)),
            scratch_shapes=[pltpu.VMEM((BATCH_SIZE * N, WORD_SIZE), jnp.float32)],
        ),
        compiler_params=pltpu.CompilerParams(
            dimension_semantics=("arbitrary",)),
    )(in_words.astype(jnp.int32), in_words_cls.astype(jnp.int32),
      target_mask.astype(jnp.float32), const_slab)


# ---------------------------------------------------------------------------
# Host-side one-time constant packing (U folded into the d-projection).
# ---------------------------------------------------------------------------
def pack_consts(params):
    W, H = WORD_SIZE, HIDDEN_SIZE
    wdu = params["wd_t"] @ params["u"]                # (W, H)
    bdu = params["bd"] @ params["u"]                  # (H,)
    slab = jnp.zeros((_SLAB_ROWS, W), jnp.float32)
    slab = slab.at[_R_ROOT:_R_ROOT + BATCH_SIZE, :].set(
        params["root_hidden"].reshape(BATCH_SIZE, W))
    slab = slab.at[_R_EMB:_R_EMB + VOCAB, :].set(params["emb"])
    slab = slab.at[_R_WE:_R_WE + W, :H].set(params["we_t"])
    slab = slab.at[_R_WDU:_R_WDU + W, :H].set(wdu)
    slab = slab.at[_R_BE, :H].set(params["be"])
    slab = slab.at[_R_BDU, :H].set(bdu)
    slab = slab.at[_R_GAMMA, :W].set(params["ln_gamma"])
    slab = slab.at[_R_BETA, :W].set(params["ln_beta"])
    return slab


def init_params(key):
    ks = jax.random.split(key, 8)
    xav_lin = (2.0 / (WORD_SIZE + HIDDEN_SIZE)) ** 0.5
    xav_u = (2.0 / (HIDDEN_SIZE + HIDDEN_SIZE)) ** 0.5
    return {
        "emb": jax.random.normal(ks[0], (VOCAB, WORD_SIZE), jnp.float32) * 0.1,
        "root_hidden": jax.random.normal(ks[1], (BATCH_SIZE, 1, WORD_SIZE),
                                         jnp.float32) * 0.2,
        "ln_gamma": jnp.ones((WORD_SIZE,), jnp.float32),
        "ln_beta": jnp.zeros((WORD_SIZE,), jnp.float32),
        # Linear weights stored already transposed to (in, out)
        "we_t": jax.random.normal(ks[2], (WORD_SIZE, HIDDEN_SIZE), jnp.float32) * xav_lin,
        "be": jax.random.normal(ks[3], (HIDDEN_SIZE,), jnp.float32) * 0.01,
        "wd_t": jax.random.normal(ks[4], (WORD_SIZE, HIDDEN_SIZE), jnp.float32) * xav_lin,
        "bd": jax.random.normal(ks[5], (HIDDEN_SIZE,), jnp.float32) * 0.01,
        "u": jax.random.normal(ks[6], (HIDDEN_SIZE, HIDDEN_SIZE), jnp.float32) * xav_u,
    }


# ---------------------------------------------------------------------------
# Pure-JAX reference (mirrors the torch forward, U NOT folded) for validation.
# ---------------------------------------------------------------------------
def dtcp_reference(in_words, in_words_cls, target_mask, params):
    tok = params["emb"][in_words]                                    # (B, L, W)
    sel = tok[jnp.arange(BATCH_SIZE)[:, None], in_words_cls, :]      # (B, E, W)
    res_e = jnp.concatenate([params["root_hidden"], sel], axis=1)    # (B, N, W)
    mean = res_e.mean(-1, keepdims=True)
    var = ((res_e - mean) ** 2).mean(-1, keepdims=True)
    xn = (res_e - mean) / jnp.sqrt(var + 1e-5) * params["ln_gamma"] + params["ln_beta"]
    e = xn @ params["we_t"] + params["be"]
    d = xn @ params["wd_t"] + params["bd"]
    du = d @ params["u"]
    attn = jnp.einsum("bik,bjk->bij", du, e)
    attn = jnp.where(target_mask[:, None, :] == 0, -100000000.0, attn)
    return jax.nn.log_softmax(attn, axis=-1)


if __name__ == "__main__":
    key = jax.random.PRNGKey(0)
    kp, k1, k2, k3 = jax.random.split(key, 4)
    params = init_params(kp)
    const_slab = pack_consts(params)   # one-time: root | emb | folded weights

    in_words = jax.random.randint(k1, (BATCH_SIZE, DOC_LEN), 0, VOCAB, dtype=jnp.int32)
    in_words_cls = jax.random.randint(k2, (BATCH_SIZE, E_NUM), 0, DOC_LEN, dtype=jnp.int32)
    # target_mask over the N = E_NUM + 1 encoder positions (root always valid)
    target_mask = (jax.random.uniform(k3, (BATCH_SIZE, N)) > 0.2).astype(jnp.float32)
    target_mask = target_mask.at[:, 0].set(1.0)

    fwd = jax.jit(dtcp_forward)
    dep_score = fwd(in_words, in_words_cls, target_mask, const_slab)
    jax.block_until_ready(dep_score)
    assert dep_score.shape == (BATCH_SIZE, N, N)

    ref = dtcp_reference(in_words, in_words_cls, target_mask, params)
    max_err = float(jnp.max(jnp.abs(dep_score - ref)))
    assert jnp.allclose(dep_score, ref, rtol=1e-4, atol=1e-3), max_err
    print("KERNEL_OK")
</pallas_src>

<mosaic_0001>
module attributes {stable_mosaic.version = 11 : i64} {
  func.func @dtcp_kernel(%arg0: i32, %arg1: memref<2x16xi32, #tpu.memory_space<smem>>, %arg2: memref<2x7xi32, #tpu.memory_space<smem>>, %arg3: memref<2x8xf32, #tpu.memory_space<vmem>>, %arg4: memref<152x32xf32, #tpu.memory_space<vmem>>, %arg5: memref<2x8x8xf32, #tpu.memory_space<vmem>>, %arg6: memref<16x32xf32, #tpu.memory_space<vmem>>) attributes {dimension_semantics = [#tpu.dimension_semantics<arbitrary>], iteration_bounds = array<i64: 1>, scalar_prefetch = 2 : i64, scratch_operands = 1 : i64, tpu.core_type = #tpu.core_type<tc>, window_params = [{pipeline_mode = #tpu.pipeline_mode<synchronous>, transform_indices = @transform_0, window_bounds = array<i64: 2, 8>}, {pipeline_mode = #tpu.pipeline_mode<synchronous>, transform_indices = @transform_1, window_bounds = array<i64: 152, 32>}, {pipeline_mode = #tpu.pipeline_mode<synchronous>, transform_indices = @transform_2, window_bounds = array<i64: 2, 8, 8>}]} {
    %c0 = arith.constant 0 : index
    %c0_0 = arith.constant 0 : index
    %0 = vector.load %arg4[%c0, %c0_0] : memref<152x32xf32, #tpu.memory_space<vmem>>, vector<1x32xf32>
    %c0_1 = arith.constant 0 : index
    %c0_2 = arith.constant 0 : index
    %1 = vector.load %arg6[%c0_1, %c0_2] : memref<16x32xf32, #tpu.memory_space<vmem>>, vector<1x32xf32>
    tpu.vector_store %arg6[%c0_1, %c0_2], %0 {strides = array<i32>} : memref<16x32xf32, #tpu.memory_space<vmem>>, vector<1x32xf32>,
    %c0_3 = arith.constant 0 : index
    %c0_4 = arith.constant 0 : index
    %2 = memref.load %arg2[%c0_3, %c0_4] : memref<2x7xi32, #tpu.memory_space<smem>>
    %c0_5 = arith.constant 0 : index
    %3 = arith.index_cast %2 : i32 to index
    %4 = memref.load %arg1[%c0_5, %3] : memref<2x16xi32, #tpu.memory_space<smem>>
    %c2_i32 = arith.constant 2 : i32
    %5 = arith.addi %c2_i32, %4 : i32
    %6 = arith.index_cast %5 : i32 to index
    %c0_6 = arith.constant 0 : index
    %7 = vector.load %arg4[%6, %c0_6] : memref<152x32xf32, #tpu.memory_space<vmem>>, vector<1x32xf32>
    %c1 = arith.constant 1 : index
    %c0_7 = arith.constant 0 : index
    %8 = vector.load %arg6[%c1, %c0_7] : memref<16x32xf32, #tpu.memory_space<vmem>>, vector<1x32xf32>
    tpu.vector_store %arg6[%c1, %c0_7], %7 {strides = array<i32>} : memref<16x32xf32, #tpu.memory_space<vmem>>, vector<1x32xf32>,
    %c0_8 = arith.constant 0 : index
    %c1_9 = arith.constant 1 : index
    %9 = memref.load %arg2[%c0_8, %c1_9] : memref<2x7xi32, #tpu.memory_space<smem>>
    %c0_10 = arith.constant 0 : index
    %10 = arith.index_cast %9 : i32 to index
    %11 = memref.load %arg1[%c0_10, %10] : memref<2x16xi32, #tpu.memory_space<smem>>
    %c2_i32_11 = arith.constant 2 : i32
    %12 = arith.addi %c2_i32_11, %11 : i32
    %13 = arith.index_cast %12 : i32 to index
    %c0_12 = arith.constant 0 : index
    %14 = vector.load %arg4[%13, %c0_12] : memref<152x32xf32, #tpu.memory_space<vmem>>, vector<1x32xf32>
    %c2 = arith.constant 2 : index
    %c0_13 = arith.constant 0 : index
    %15 = vector.load %arg6[%c2, %c0_13] : memref<16x32xf32, #tpu.memory_space<vmem>>, vector<1x32xf32>
    tpu.vector_store %arg6[%c2, %c0_13], %14 {strides = array<i32>} : memref<16x32xf32, #tpu.memory_space<vmem>>, vector<1x32xf32>,
    %c0_14 = arith.constant 0 : index
    %c2_15 = arith.constant 2 : index
    %16 = memref.load %arg2[%c0_14, %c2_15] : memref<2x7xi32, #tpu.memory_space<smem>>
    %c0_16 = arith.constant 0 : index
    %17 = arith.index_cast %16 : i32 to index
    %18 = memref.load %arg1[%c0_16, %17] : memref<2x16xi32, #tpu.memory_space<smem>>
    %c2_i32_17 = arith.constant 2 : i32
    %19 = arith.addi %c2_i32_17, %18 : i32
    %20 = arith.index_cast %19 : i32 to index
    %c0_18 = arith.constant 0 : index
    %21 = vector.load %arg4[%20, %c0_18] : memref<152x32xf32, #tpu.memory_space<vmem>>, vector<1x32xf32>
    %c3 = arith.constant 3 : index
    %c0_19 = arith.constant 0 : index
    %22 = vector.load %arg6[%c3, %c0_19] : memref<16x32xf32, #tpu.memory_space<vmem>>, vector<1x32xf32>
    tpu.vector_store %arg6[%c3, %c0_19], %21 {strides = array<i32>} : memref<16x32xf32, #tpu.memory_space<vmem>>, vector<1x32xf32>,
    %c0_20 = arith.constant 0 : index
    %c3_21 = arith.constant 3 : index
    %23 = memref.load %arg2[%c0_20, %c3_21] : memref<2x7xi32, #tpu.memory_space<smem>>
    %c0_22 = arith.constant 0 : index
    %24 = arith.index_cast %23 : i32 to index
    %25 = memref.load %arg1[%c0_22, %24] : memref<2x16xi32, #tpu.memory_space<smem>>
    %c2_i32_23 = arith.constant 2 : i32
    %26 = arith.addi %c2_i32_23, %25 : i32
    %27 = arith.index_cast %26 : i32 to index
    %c0_24 = arith.constant 0 : index
    %28 = vector.load %arg4[%27, %c0_24] : memref<152x32xf32, #tpu.memory_space<vmem>>, vector<1x32xf32>
    %c4 = arith.constant 4 : index
    %c0_25 = arith.constant 0 : index
    %29 = vector.load %arg6[%c4, %c0_25] : memref<16x32xf32, #tpu.memory_space<vmem>>, vector<1x32xf32>
    tpu.vector_store %arg6[%c4, %c0_25], %28 {strides = array<i32>} : memref<16x32xf32, #tpu.memory_space<vmem>>, vector<1x32xf32>,
    %c0_26 = arith.constant 0 : index
    %c4_27 = arith.constant 4 : index
    %30 = memref.load %arg2[%c0_26, %c4_27] : memref<2x7xi32, #tpu.memory_space<smem>>
    %c0_28 = arith.constant 0 : index
    %31 = arith.index_cast %30 : i32 to index
    %32 = memref.load %arg1[%c0_28, %31] : memref<2x16xi32, #tpu.memory_space<smem>>
    %c2_i32_29 = arith.constant 2 : i32
    %33 = arith.addi %c2_i32_29, %32 : i32
    %34 = arith.index_cast %33 : i32 to index
    %c0_30 = arith.constant 0 : index
    %35 = vector.load %arg4[%34, %c0_30] : memref<152x32xf32, #tpu.memory_space<vmem>>, vector<1x32xf32>
    %c5 = arith.constant 5 : index
    %c0_31 = arith.constant 0 : index
    %36 = vector.load %arg6[%c5, %c0_31] : memref<16x32xf32, #tpu.memory_space<vmem>>, vector<1x32xf32>
    tpu.vector_store %arg6[%c5, %c0_31], %35 {strides = array<i32>} : memref<16x32xf32, #tpu.memory_space<vmem>>, vector<1x32xf32>,
    %c0_32 = arith.constant 0 : index
    %c5_33 = arith.constant 5 : index
    %37 = memref.load %arg2[%c0_32, %c5_33] : memref<2x7xi32, #tpu.memory_space<smem>>
    %c0_34 = arith.constant 0 : index
    %38 = arith.index_cast %37 : i32 to index
    %39 = memref.load %arg1[%c0_34, %38] : memref<2x16xi32, #tpu.memory_space<smem>>
    %c2_i32_35 = arith.constant 2 : i32
    %40 = arith.addi %c2_i32_35, %39 : i32
    %41 = arith.index_cast %40 : i32 to index
    %c0_36 = arith.constant 0 : index
    %42 = vector.load %arg4[%41, %c0_36] : memref<152x32xf32, #tpu.memory_space<vmem>>, vector<1x32xf32>
    %c6 = arith.constant 6 : index
    %c0_37 = arith.constant 0 : index
    %43 = vector.load %arg6[%c6, %c0_37] : memref<16x32xf32, #tpu.memory_space<vmem>>, vector<1x32xf32>
    tpu.vector_store %arg6[%c6, %c0_37], %42 {strides = array<i32>} : memref<16x32xf32, #tpu.memory_space<vmem>>, vector<1x32xf32>,
    %c0_38 = arith.constant 0 : index
    %c6_39 = arith.constant 6 : index
    %44 = memref.load %arg2[%c0_38, %c6_39] : memref<2x7xi32, #tpu.memory_space<smem>>
    %c0_40 = arith.constant 0 : index
    %45 = arith.index_cast %44 : i32 to index
    %46 = memref.load %arg1[%c0_40, %45] : memref<2x16xi32, #tpu.memory_space<smem>>
    %c2_i32_41 = arith.constant 2 : i32
    %47 = arith.addi %c2_i32_41, %46 : i32
    %48 = arith.index_cast %47 : i32 to index
    %c0_42 = arith.constant 0 : index
    %49 = vector.load %arg4[%48, %c0_42] : memref<152x32xf32, #tpu.memory_space<vmem>>, vector<1x32xf32>
    %c7 = arith.constant 7 : index
    %c0_43 = arith.constant 0 : index
    %50 = vector.load %arg6[%c7, %c0_43] : memref<16x32xf32, #tpu.memory_space<vmem>>, vector<1x32xf32>
    tpu.vector_store %arg6[%c7, %c0_43], %49 {strides = array<i32>} : memref<16x32xf32, #tpu.memory_space<vmem>>, vector<1x32xf32>,
    %c1_44 = arith.constant 1 : index
    %c0_45 = arith.constant 0 : index
    %51 = vector.load %arg4[%c1_44, %c0_45] : memref<152x32xf32, #tpu.memory_space<vmem>>, vector<1x32xf32>
    %c8 = arith.constant 8 : index
    %c0_46 = arith.constant 0 : index
    %52 = vector.load %arg6[%c8, %c0_46] : memref<16x32xf32, #tpu.memory_space<vmem>>, vector<1x32xf32>
    tpu.vector_store %arg6[%c8, %c0_46], %51 {strides = array<i32>} : memref<16x32xf32, #tpu.memory_space<vmem>>, vector<1x32xf32>,
    %c1_47 = arith.constant 1 : index
    %c0_48 = arith.constant 0 : index
    %53 = memref.load %arg2[%c1_47, %c0_48] : memref<2x7xi32, #tpu.memory_space<smem>>
    %c1_49 = arith.constant 1 : index
    %54 = arith.index_cast %53 : i32 to index
    %55 = memref.load %arg1[%c1_49, %54] : memref<2x16xi32, #tpu.memory_space<smem>>
    %c2_i32_50 = arith.constant 2 : i32
    %56 = arith.addi %c2_i32_50, %55 : i32
    %57 = arith.index_cast %56 : i32 to index
    %c0_51 = arith.constant 0 : index
    %58 = vector.load %arg4[%57, %c0_51] : memref<152x32xf32, #tpu.memory_space<vmem>>, vector<1x32xf32>
    %c9 = arith.constant 9 : index
    %c0_52 = arith.constant 0 : index
    %59 = vector.load %arg6[%c9, %c0_52] : memref<16x32xf32, #tpu.memory_space<vmem>>, vector<1x32xf32>
    tpu.vector_store %arg6[%c9, %c0_52], %58 {strides = array<i32>} : memref<16x32xf32, #tpu.memory_space<vmem>>, vector<1x32xf32>,
    %c1_53 = arith.constant 1 : index
    %c1_54 = arith.constant 1 : index
    %60 = memref.load %arg2[%c1_53, %c1_54] : memref<2x7xi32, #tpu.memory_space<smem>>
    %c1_55 = arith.constant 1 : index
    %61 = arith.index_cast %60 : i32 to index
    %62 = memref.load %arg1[%c1_55, %61] : memref<2x16xi32, #tpu.memory_space<smem>>
    %c2_i32_56 = arith.constant 2 : i32
    %63 = arith.addi %c2_i32_56, %62 : i32
    %64 = arith.index_cast %63 : i32 to index
    %c0_57 = arith.constant 0 : index
    %65 = vector.load %arg4[%64, %c0_57] : memref<152x32xf32, #tpu.memory_space<vmem>>, vector<1x32xf32>
    %c10 = arith.constant 10 : index
    %c0_58 = arith.constant 0 : index
    %66 = vector.load %arg6[%c10, %c0_58] : memref<16x32xf32, #tpu.memory_space<vmem>>, vector<1x32xf32>
    tpu.vector_store %arg6[%c10, %c0_58], %65 {strides = array<i32>} : memref<16x32xf32, #tpu.memory_space<vmem>>, vector<1x32xf32>,
    %c1_59 = arith.constant 1 : index
    %c2_60 = arith.constant 2 : index
    %67 = memref.load %arg2[%c1_59, %c2_60] : memref<2x7xi32, #tpu.memory_space<smem>>
    %c1_61 = arith.constant 1 : index
    %68 = arith.index_cast %67 : i32 to index
    %69 = memref.load %arg1[%c1_61, %68] : memref<2x16xi32, #tpu.memory_space<smem>>
    %c2_i32_62 = arith.constant 2 : i32
    %70 = arith.addi %c2_i32_62, %69 : i32
    %71 = arith.index_cast %70 : i32 to index
    %c0_63 = arith.constant 0 : index
    %72 = vector.load %arg4[%71, %c0_63] : memref<152x32xf32, #tpu.memory_space<vmem>>, vector<1x32xf32>
    %c11 = arith.constant 11 : index
    %c0_64 = arith.constant 0 : index
    %73 = vector.load %arg6[%c11, %c0_64] : memref<16x32xf32, #tpu.memory_space<vmem>>, vector<1x32xf32>
    tpu.vector_store %arg6[%c11, %c0_64], %72 {strides = array<i32>} : memref<16x32xf32, #tpu.memory_space<vmem>>, vector<1x32xf32>,
    %c1_65 = arith.constant 1 : index
    %c3_66 = arith.constant 3 : index
    %74 = memref.load %arg2[%c1_65, %c3_66] : memref<2x7xi32, #tpu.memory_space<smem>>
    %c1_67 = arith.constant 1 : index
    %75 = arith.index_cast %74 : i32 to index
    %76 = memref.load %arg1[%c1_67, %75] : memref<2x16xi32, #tpu.memory_space<smem>>
    %c2_i32_68 = arith.constant 2 : i32
    %77 = arith.addi %c2_i32_68, %76 : i32
    %78 = arith.index_cast %77 : i32 to index
    %c0_69 = arith.constant 0 : index
    %79 = vector.load %arg4[%78, %c0_69] : memref<152x32xf32, #tpu.memory_space<vmem>>, vector<1x32xf32>
    %c12 = arith.constant 12 : index
    %c0_70 = arith.constant 0 : index
    %80 = vector.load %arg6[%c12, %c0_70] : memref<16x32xf32, #tpu.memory_space<vmem>>, vector<1x32xf32>
    tpu.vector_store %arg6[%c12, %c0_70], %79 {strides = array<i32>} : memref<16x32xf32, #tpu.memory_space<vmem>>, vector<1x32xf32>,
    %c1_71 = arith.constant 1 : index
    %c4_72 = arith.constant 4 : index
    %81 = memref.load %arg2[%c1_71, %c4_72] : memref<2x7xi32, #tpu.memory_space<smem>>
    %c1_73 = arith.constant 1 : index
    %82 = arith.index_cast %81 : i32 to index
    %83 = memref.load %arg1[%c1_73, %82] : memref<2x16xi32, #tpu.memory_space<smem>>
    %c2_i32_74 = arith.constant 2 : i32
    %84 = arith.addi %c2_i32_74, %83 : i32
    %85 = arith.index_cast %84 : i32 to index
    %c0_75 = arith.constant 0 : index
    %86 = vector.load %arg4[%85, %c0_75] : memref<152x32xf32, #tpu.memory_space<vmem>>, vector<1x32xf32>
    %c13 = arith.constant 13 : index
    %c0_76 = arith.constant 0 : index
    %87 = vector.load %arg6[%c13, %c0_76] : memref<16x32xf32, #tpu.memory_space<vmem>>, vector<1x32xf32>
    tpu.vector_store %arg6[%c13, %c0_76], %86 {strides = array<i32>} : memref<16x32xf32, #tpu.memory_space<vmem>>, vector<1x32xf32>,
    %c1_77 = arith.constant 1 : index
    %c5_78 = arith.constant 5 : index
    %88 = memref.load %arg2[%c1_77, %c5_78] : memref<2x7xi32, #tpu.memory_space<smem>>
    %c1_79 = arith.constant 1 : index
    %89 = arith.index_cast %88 : i32 to index
    %90 = memref.load %arg1[%c1_79, %89] : memref<2x16xi32, #tpu.memory_space<smem>>
    %c2_i32_80 = arith.constant 2 : i32
    %91 = arith.addi %c2_i32_80, %90 : i32
    %92 = arith.index_cast %91 : i32 to index
    %c0_81 = arith.constant 0 : index
    %93 = vector.load %arg4[%92, %c0_81] : memref<152x32xf32, #tpu.memory_space<vmem>>, vector<1x32xf32>
    %c14 = arith.constant 14 : index
    %c0_82 = arith.constant 0 : index
    %94 = vector.load %arg6[%c14, %c0_82] : memref<16x32xf32, #tpu.memory_space<vmem>>, vector<1x32xf32>
    tpu.vector_store %arg6[%c14, %c0_82], %93 {strides = array<i32>} : memref<16x32xf32, #tpu.memory_space<vmem>>, vector<1x32xf32>,
    %c1_83 = arith.constant 1 : index
    %c6_84 = arith.constant 6 : index
    %95 = memref.load %arg2[%c1_83, %c6_84] : memref<2x7xi32, #tpu.memory_space<smem>>
    %c1_85 = arith.constant 1 : index
    %96 = arith.index_cast %95 : i32 to index
    %97 = memref.load %arg1[%c1_85, %96] : memref<2x16xi32, #tpu.memory_space<smem>>
    %c2_i32_86 = arith.constant 2 : i32
    %98 = arith.addi %c2_i32_86, %97 : i32
    %99 = arith.index_cast %98 : i32 to index
    %c0_87 = arith.constant 0 : index
    %100 = vector.load %arg4[%99, %c0_87] : memref<152x32xf32, #tpu.memory_space<vmem>>, vector<1x32xf32>
    %c15 = arith.constant 15 : index
    %c0_88 = arith.constant 0 : index
    %101 = vector.load %arg6[%c15, %c0_88] : memref<16x32xf32, #tpu.memory_space<vmem>>, vector<1x32xf32>
    tpu.vector_store %arg6[%c15, %c0_88], %100 {strides = array<i32>} : memref<16x32xf32, #tpu.memory_space<vmem>>, vector<1x32xf32>,
    %c0_89 = arith.constant 0 : index
    %c0_90 = arith.constant 0 : index
    %102 = vector.load %arg6[%c0_89, %c0_90] : memref<16x32xf32, #tpu.memory_space<vmem>>, vector<16x32xf32>
    %c56 = arith.constant 56 : index
    %c0_91 = arith.constant 0 : index
    %103 = vector.load %arg4[%c56, %c0_91] : memref<152x32xf32, #tpu.memory_space<vmem>>, vector<32x32xf32>
    %c88 = arith.constant 88 : index
    %c0_92 = arith.constant 0 : index
    %104 = vector.load %arg4[%c88, %c0_92] : memref<152x32xf32, #tpu.memory_space<vmem>>, vector<32x32xf32>
    %c120 = arith.constant 120 : index
    %c0_93 = arith.constant 0 : index
    %105 = vector.load %arg4[%c120, %c0_93] : memref<152x32xf32, #tpu.memory_space<vmem>>, vector<1x32xf32>
    %c128 = arith.constant 128 : index
    %c0_94 = arith.constant 0 : index
    %106 = vector.load %arg4[%c128, %c0_94] : memref<152x32xf32, #tpu.memory_space<vmem>>, vector<1x32xf32>
    %c136 = arith.constant 136 : index
    %c0_95 = arith.constant 0 : index
    %107 = vector.load %arg4[%c136, %c0_95] : memref<152x32xf32, #tpu.memory_space<vmem>>, vector<1x32xf32>
    %c144 = arith.constant 144 : index
    %c0_96 = arith.constant 0 : index
    %108 = vector.load %arg4[%c144, %c0_96] : memref<152x32xf32, #tpu.memory_space<vmem>>, vector<1x32xf32>
    %cst = arith.constant dense<0.000000e+00> : vector<16xf32>
    %109 = vector.multi_reduction <add>, %102, %cst [1] : vector<16x32xf32> to vector<16xf32>
    %110 = vector.shape_cast %109 : vector<16xf32> to vector<16x1xf32>
    %cst_97 = arith.constant 3.200000e+01 : f32
    %111 = vector.broadcast %cst_97 : f32 to vector<16x1xf32>
    %112 = arith.divf %110, %111 : vector<16x1xf32>
    %113 = vector.broadcast %112 : vector<16x1xf32> to vector<16x32xf32>
    %114 = arith.subf %102, %113 : vector<16x32xf32>
    %115 = arith.mulf %114, %114 : vector<16x32xf32>
    %cst_98 = arith.constant dense<0.000000e+00> : vector<16xf32>
    %116 = vector.multi_reduction <add>, %115, %cst_98 [1] : vector<16x32xf32> to vector<16xf32>
    %117 = vector.shape_cast %116 : vector<16xf32> to vector<16x1xf32>
    %cst_99 = arith.constant 3.200000e+01 : f32
    %118 = vector.broadcast %cst_99 : f32 to vector<16x1xf32>
    %119 = arith.divf %117, %118 : vector<16x1xf32>
    %cst_100 = arith.constant 9.99999974E-6 : f32
    %120 = vector.broadcast %cst_100 : f32 to vector<16x1xf32>
    %121 = arith.addf %119, %120 : vector<16x1xf32>
    %122 = math.rsqrt %121 : vector<16x1xf32>
    %123 = vector.broadcast %122 : vector<16x1xf32> to vector<16x32xf32>
    %124 = arith.mulf %114, %123 : vector<16x32xf32>
    %125 = vector.broadcast %107 : vector<1x32xf32> to vector<16x32xf32>
    %126 = arith.mulf %124, %125 : vector<16x32xf32>
    %127 = vector.broadcast %108 : vector<1x32xf32> to vector<16x32xf32>
    %128 = arith.addf %126, %127 : vector<16x32xf32>
    %cst_101 = arith.constant dense<0.000000e+00> : vector<16x32xf32>
    %129 = tpu.matmul %128, %103, %cst_101 {dimension_numbers = #tpu.dot_dimension_numbers<[1], [0], [0], [1], [0, 0, 1, 1], [], []>} : vector<16x32xf32>, vector<32x32xf32>, vector<16x32xf32> -> vector<16x32xf32>
    %130 = vector.broadcast %105 : vector<1x32xf32> to vector<16x32xf32>
    %131 = arith.addf %129, %130 : vector<16x32xf32>
    %cst_102 = arith.constant dense<0.000000e+00> : vector<16x32xf32>
    %132 = tpu.matmul %128, %104, %cst_102 {dimension_numbers = #tpu.dot_dimension_numbers<[1], [0], [0], [1], [0, 0, 1, 1], [], []>} : vector<16x32xf32>, vector<32x32xf32>, vector<16x32xf32> -> vector<16x32xf32>
    %133 = vector.broadcast %106 : vector<1x32xf32> to vector<16x32xf32>
    %134 = arith.addf %132, %133 : vector<16x32xf32>
    %135 = vector.extract_strided_slice %131 {offsets = [0, 0], sizes = [8, 32], strides = [1, 1]} : vector<16x32xf32> to vector<8x32xf32>
    %136 = vector.extract_strided_slice %134 {offsets = [0, 0], sizes = [8, 32], strides = [1, 1]} : vector<16x32xf32> to vector<8x32xf32>
    %cst_103 = arith.constant dense<0.000000e+00> : vector<8x8xf32>
    %137 = tpu.matmul %136, %135, %cst_103 {dimension_numbers = #tpu.dot_dimension_numbers<[1], [1], [0], [0], [0, 0, 1, 0], [], []>} : vector<8x32xf32>, vector<8x32xf32>, vector<8x8xf32> -> vector<8x8xf32>
    %c0_104 = arith.constant 0 : index
    %c0_105 = arith.constant 0 : index
    %138 = vector.load %arg3[%c0_104, %c0_105] : memref<2x8xf32, #tpu.memory_space<vmem>>, vector<1x8xf32>
    %cst_106 = arith.constant 0.000000e+00 : f32
    %139 = vector.broadcast %cst_106 : f32 to vector<1x8xf32>
    %140 = arith.cmpf oeq, %138, %139 : vector<1x8xf32>
    %cst_107 = arith.constant -1.000000e+08 : f32
    %141 = vector.shape_cast %140 : vector<1x8xi1> to vector<1x8xi1>
    %142 = vector.broadcast %141 : vector<1x8xi1> to vector<8x8xi1>
    %143 = vector.broadcast %cst_107 : f32 to vector<8x8xf32>
    %144 = arith.select %142, %143, %137 : vector<8x8xi1>, vector<8x8xf32>
    %cst_108 = arith.constant dense<0xFF800000> : vector<8xf32>
    %145 = vector.multi_reduction <maximumf>, %144, %cst_108 [1] : vector<8x8xf32> to vector<8xf32>
    %146 = vector.shape_cast %145 : vector<8xf32> to vector<8x1xf32>
    %147 = vector.broadcast %146 : vector<8x1xf32> to vector<8x8xf32>
    %148 = arith.subf %144, %147 : vector<8x8xf32>
    %149 = math.exp %148 : vector<8x8xf32>
    %cst_109 = arith.constant dense<0.000000e+00> : vector<8xf32>
    %150 = vector.multi_reduction <add>, %149, %cst_109 [1] : vector<8x8xf32> to vector<8xf32>
    %151 = vector.shape_cast %150 : vector<8xf32> to vector<8x1xf32>
    %152 = math.log %151 : vector<8x1xf32>
    %153 = arith.addf %146, %152 : vector<8x1xf32>
    %154 = vector.broadcast %153 : vector<8x1xf32> to vector<8x8xf32>
    %155 = arith.subf %144, %154 : vector<8x8xf32>
    %c0_110 = arith.constant 0 : index
    %c0_111 = arith.constant 0 : index
    %c0_112 = arith.constant 0 : index
    %156 = vector.load %arg5[%c0_110, %c0_111, %c0_112] : memref<2x8x8xf32, #tpu.memory_space<vmem>>, vector<1x8x8xf32>
    %157 = vector.shape_cast %156 : vector<1x8x8xf32> to vector<8x8xf32>
    %158 = vector.shape_cast %155 : vector<8x8xf32> to vector<1x8x8xf32>
    tpu.vector_store %arg5[%c0_110, %c0_111, %c0_112], %158 {strides = array<i32>} : memref<2x8x8xf32, #tpu.memory_space<vmem>>, vector<1x8x8xf32>,
    %159 = vector.extract_strided_slice %131 {offsets = [8, 0], sizes = [8, 32], strides = [1, 1]} : vector<16x32xf32> to vector<8x32xf32>
    %160 = vector.extract_strided_slice %134 {offsets = [8, 0], sizes = [8, 32], strides = [1, 1]} : vector<16x32xf32> to vector<8x32xf32>
    %cst_113 = arith.constant dense<0.000000e+00> : vector<8x8xf32>
    %161 = tpu.matmul %160, %159, %cst_113 {dimension_numbers = #tpu.dot_dimension_numbers<[1], [1], [0], [0], [0, 0, 1, 0], [], []>} : vector<8x32xf32>, vector<8x32xf32>, vector<8x8xf32> -> vector<8x8xf32>
    %c1_114 = arith.constant 1 : index
    %c0_115 = arith.constant 0 : index
    %162 = vector.load %arg3[%c1_114, %c0_115] : memref<2x8xf32, #tpu.memory_space<vmem>>, vector<1x8xf32>
    %cst_116 = arith.constant 0.000000e+00 : f32
    %163 = vector.broadcast %cst_116 : f32 to vector<1x8xf32>
    %164 = arith.cmpf oeq, %162, %163 : vector<1x8xf32>
    %cst_117 = arith.constant -1.000000e+08 : f32
    %165 = vector.shape_cast %164 : vector<1x8xi1> to vector<1x8xi1>
    %166 = vector.broadcast %165 : vector<1x8xi1> to vector<8x8xi1>
    %167 = vector.broadcast %cst_117 : f32 to vector<8x8xf32>
    %168 = arith.select %166, %167, %161 : vector<8x8xi1>, vector<8x8xf32>
    %cst_118 = arith.constant dense<0xFF800000> : vector<8xf32>
    %169 = vector.multi_reduction <maximumf>, %168, %cst_118 [1] : vector<8x8xf32> to vector<8xf32>
    %170 = vector.shape_cast %169 : vector<8xf32> to vector<8x1xf32>
    %171 = vector.broadcast %170 : vector<8x1xf32> to vector<8x8xf32>
    %172 = arith.subf %168, %171 : vector<8x8xf32>
    %173 = math.exp %172 : vector<8x8xf32>
    %cst_119 = arith.constant dense<0.000000e+00> : vector<8xf32>
    %174 = vector.multi_reduction <add>, %173, %cst_119 [1] : vector<8x8xf32> to vector<8xf32>
    %175 = vector.shape_cast %174 : vector<8xf32> to vector<8x1xf32>
    %176 = math.log %175 : vector<8x1xf32>
    %177 = arith.addf %170, %176 : vector<8x1xf32>
    %178 = vector.broadcast %177 : vector<8x1xf32> to vector<8x8xf32>
    %179 = arith.subf %168, %178 : vector<8x8xf32>
    %c1_120 = arith.constant 1 : index
    %c0_121 = arith.constant 0 : index
    %c0_122 = arith.constant 0 : index
    %180 = vector.load %arg5[%c1_120, %c0_121, %c0_122] : memref<2x8x8xf32, #tpu.memory_space<vmem>>, vector<1x8x8xf32>
    %181 = vector.shape_cast %180 : vector<1x8x8xf32> to vector<8x8xf32>
    %182 = vector.shape_cast %179 : vector<8x8xf32> to vector<1x8x8xf32>
    tpu.vector_store %arg5[%c1_120, %c0_121, %c0_122], %182 {strides = array<i32>} : memref<2x8x8xf32, #tpu.memory_space<vmem>>, vector<1x8x8xf32>,
    return
  }
  func.func @transform_0(%arg0: i32, %arg1: memref<2x16xi32, #tpu.memory_space<smem>>, %arg2: memref<2x7xi32, #tpu.memory_space<smem>>) -> (i32, i32) {
    %c0_i32 = arith.constant 0 : i32
    %c0_i32_0 = arith.constant 0 : i32
    %c0_i32_1 = arith.constant 0 : i32
    return %c0_i32, %c0_i32_0 : i32, i32
  }
  func.func @transform_1(%arg0: i32, %arg1: memref<2x16xi32, #tpu.memory_space<smem>>, %arg2: memref<2x7xi32, #tpu.memory_space<smem>>) -> (i32, i32) {
    %c0_i32 = arith.constant 0 : i32
    %c0_i32_0 = arith.constant 0 : i32
    %c0_i32_1 = arith.constant 0 : i32
    return %c0_i32, %c0_i32_0 : i32, i32
  }
  func.func @transform_2(%arg0: i32, %arg1: memref<2x16xi32, #tpu.memory_space<smem>>, %arg2: memref<2x7xi32, #tpu.memory_space<smem>>) -> (i32, i32, i32) {
    %c0_i32 = arith.constant 0 : i32
    %c0_i32_0 = arith.constant 0 : i32
    %c0_i32_1 = arith.constant 0 : i32
    %c0_i32_2 = arith.constant 0 : i32
    return %c0_i32, %c0_i32_0, %c0_i32_1 : i32, i32, i32
  }
}

</mosaic_0001>

<bundles_post_ra>
// kernel: dtcp_forward.1
= control target key start
LH: loop header
LB: loop body
LE: loop exit
PB: predicated region body
PF: predicated region fallthrough
CT: control target
= control target key end

     0   :  { %s1013_s0 = inlined_call_operand.vmem [shape: s32[2,16], index: 0, kind: input, shape index: {}]   ;;  %s1014_s2 = inlined_call_operand.vmem [shape: f32[2,8], index: 2, kind: input, shape index: {}]   ;;  %s1015_s3 = inlined_call_operand.vmem [shape: f32[152,32], index: 3, kind: input, shape index: {}]   ;;  %s1016_s4 = inlined_call_operand.hbm [shape: f32[2,8,8], index: 4, kind: output, shape index: {}]   ;;  %s1017_s1 = inlined_call_operand.vmem [shape: s32[2,7], index: 1, kind: input, shape index: {}]  }
   0x1   :  { %1019 = sst [smem:[#allocation10_spill]] %s1016_s4  ;;  %s9_s17 = sshll.u32 %s1013_s0, 4  ;;  %s10_s17 = int_to_ptr.vmem [resolvable:$true] %s9_s17 }
   0x2   :  { %s13_s20 = sshll.u32 %s1017_s1, 4  ;;  %s768_s21 = scalar_lea.vmem %s10_s17, 32  ;;  %s14_s20 = int_to_ptr.vmem [resolvable:$true] %s13_s20 }
   0x3   :  { %p769_p0 = scmp.ne.s32.totalorder %s10_s17, %s768_s21  ;;  %p773_p1 = scmp.lt.s32.totalorder %s10_s17, %s10_s17 }
   0x4   :  { %p774_p2 = scmp.lt.s32.totalorder %s768_s21, %s768_s21 }
   0x6   :  { %p775_p3 = por %p774_p2, %p773_p1 }
   0x8   :  { %p776_p4 = pnand %p775_p3, %p769_p0 }
   0xa   :  { %779 = shalt.err (!%p776_p4)  }
   0xb   :  { %s818_s22 = smov [#allocation4]   ;;  %s780_s23 = scalar_lea.vmem %s14_s20, 32 }
   0xc   :  { %12 = dma.vmem_to_smem %s10_s17, 32, %s818_s22, [#allocation3] }
   0xd   :  { %p781_p5 = scmp.ne.s32.totalorder %s14_s20, %s780_s23  ;;  %p785_p6 = scmp.lt.s32.totalorder %s14_s20, %s14_s20 }
   0xe   :  { %p786_p7 = scmp.lt.s32.totalorder %s780_s23, %s780_s23 }
  0x10   :  { %p787_p8 = por %p786_p7, %p785_p6 }
  0x12   :  { %p788_p9 = pnand %p787_p8, %p781_p5 }
  0x14   :  { %791 = shalt.err (!%p788_p9)  }
  0x15   :  { %s819_s0 = smov [#allocation5]  }
  0x16   :  { %16 = dma.vmem_to_smem %s14_s20, 32, %s819_s0, [#allocation3] }
  0x17   :  { %814 = dma.done.wait [#allocation3], 64 }
  0x18   :  { %815 = vsyncadd [#allocation3], 4294967232 }
  0x19   :  { %18 = sfence }
  0x1a   :  { %v24_v0 = vld [vmem:[%s1015_s3] sm:$0x1]  ;;  %vm25_vm0 = vcmask 253952   ;;  %s27_s25 = sld [smem:[#allocation5]]  ;;  %s625_s26 = sld [smem:[#allocation5 + $0x1]] }
  0x1b   :  { %26 = vst.msk [vmem:[#allocation2] sm:$0x1] %vm25_vm0, %v24_v0  ;;  %s627_s27 = sld [smem:[#allocation5 + $0x2]]  ;;  %v69_v1 = vld [vmem:[%s1015_s3 + $0x1] sm:$0x1]  ;;  %s629_s30 = sld [smem:[#allocation5 + $0x3]] }
  0x1c   :  { %s631_s5 = sld [smem:[#allocation5 + $0x4]]  ;;  %70 = vst.msk [vmem:[#allocation2 + $0x8] sm:$0x1] %vm25_vm0, %v69_v1 }
  0x1d   :  { %19 = vsyncpa [#allocation7], 0  ;;  %s633_s6 = sld [smem:[#allocation5 + $0x5]]  ;;  %s635_s7 = sld [smem:[#allocation5 + $0x6]]  ;;  %vm176_vm1 = vcmask 261120   ;;  %v164_v30 = vld [vmem:[%s1015_s3 + $0x38] sm:$0xff] }
  0x1e   :  { %s865_s8 = sld [smem:[#allocation5 + $0x80]]  ;;  %s867_s9 = sld [smem:[#allocation5 + $0x81]]  ;;  %v165_v31 = vld [vmem:[%s1015_s3 + $0x40] sm:$0xff]  ;;  %v168_v32 = vld [vmem:[%s1015_s3 + $0x58] sm:$0xff]  ;;  %v166_v35 = vld [vmem:[%s1015_s3 + $0x48] sm:$0xff]  ;;  %v820_v58 = vmov 0.0  }
  0x1f   :  { %s869_s10 = sld [smem:[#allocation5 + $0x82]]  ;;  %s871_s11 = sld [smem:[#allocation5 + $0x83]]  ;;  %v732_v33 = vpack.c.bf16 %v165_v31, %v164_v30  ;;  %v169_v34 = vld [vmem:[%s1015_s3 + $0x60] sm:$0xff]  ;;  %v167_v36 = vld [vmem:[%s1015_s3 + $0x50] sm:$0xff]  ;;  %v170_v39 = vld [vmem:[%s1015_s3 + $0x68] sm:$0xff]  ;;  %vm821_vm2 = vmmov 0  }
  0x20   :  { %s28_s12 = sld [smem:[#allocation4 + %s27_s25]]  ;;  %v740_v37 = vpack.c.bf16 %v169_v34, %v168_v32  ;;  %v736_v38 = vpack.c.bf16 %v167_v36, %v166_v35  ;;  %v171_v40 = vld [vmem:[%s1015_s3 + $0x70] sm:$0xff]  ;;  %v658_v46 = vld [vmem:[%s1015_s3 + $0x88] ss:$0 sm:$0xff]  ;;  %v660_v59 = vld [vmem:[%s1015_s3 + $0x78] ss:$0 sm:$0xff] }
  0x21   :  { %s873_s13 = sld [smem:[#allocation5 + $0x84]]  ;;  %733 = vmatprep.subr.bf16.mxu0 %v732_v33  ;;  %v744_v41 = vpack.c.bf16 %v171_v40, %v170_v39  ;;  %v659_v48 = vld [vmem:[%s1015_s3 + $0x90] ss:$0 sm:$0xff]  ;;  %v663_v63 = vld [vmem:[%s1015_s3 + $0x80] ss:$0 sm:$0xff]  ;;  %vm465_vm7 = vcmask 64512  }
  0x22   :  { %s34_s14 = sld [smem:[#allocation4 + %s625_s26]]  ;;  %741 = vmatprep.subr.bf16.mxu1 %v740_v37  ;;  %735 = vmatpush3.bf16.msra.mxu0 %v732_v33 }
  0x23   :  { %s40_s15 = sld [smem:[#allocation4 + %s627_s27]]  ;;  %743 = vmatpush3.bf16.msra.mxu1 %v740_v37  ;;  %737 = vmatprep.subr.bf16.mxu0 %v736_v38 }
  0x24   :  { %s46_s16 = sld [smem:[#allocation4 + %s629_s30]]  ;;  %s72_s20 = sshra.s32 %s865_s8, 7  ;;  %745 = vmatprep.subr.bf16.mxu1 %v744_v41 }
  0x25   :  { %s52_s17 = sld [smem:[#allocation4 + %s631_s5]]  ;;  %s77_s21 = sand.u32 127, %s865_s8 }
  0x26   :  { %s58_s18 = sld [smem:[#allocation4 + %s633_s6]]  ;;  %s670_s22 = sshll.u32 %s72_s20, 7  ;;  %739 = vmatpush3.bf16.msra.mxu0 %v736_v38 }
  0x27   :  { %s64_s19 = sld [smem:[#allocation4 + %s635_s7]]  ;;  %s85_s23 = sshra.s32 %s867_s9, 7  ;;  %747 = vmatpush3.bf16.msra.mxu1 %v744_v41  ;;  %722 = vmatprep.subr.mxu0 %v820_v58 }
  0x28   :  { %s596_s24 = scalar_lea.vmem %s1015_s3, %s28_s12  ;;  %s671_s28 = sadd.s32 128, %s670_s22  ;;  %727 = vmatprep.subr.mxu1 %v820_v58 }
  0x29   :  { %v624_v2 = vld [vmem:[%s596_s24 + $0x2] sm:$0x1]  ;;  %s598_s4 = scalar_lea.vmem %s1015_s3, %s34_s14  ;;  %s600_s30 = scalar_lea.vmem %s1015_s3, %s40_s15 }
  0x2a   :  { %32 = vst.msk [vmem:[#allocation2 + $0x1] sm:$0x1] %vm25_vm0, %v624_v2  ;;  %v626_v3 = vld [vmem:[%s598_s4 + $0x2] sm:$0x1]  ;;  %s602_s7 = scalar_lea.vmem %s1015_s3, %s46_s16  ;;  %s672_s1 = sshll.u32 %s85_s23, 7 }
  0x2b   :  { %v628_v4 = vld [vmem:[%s600_s30 + $0x2] sm:$0x1]  ;;  %s604_s20 = scalar_lea.vmem %s1015_s3, %s52_s17  ;;  %38 = vst.msk [vmem:[#allocation2 + $0x2] sm:$0x1] %vm25_vm0, %v626_v3  ;;  %s78_s17 = sadd.s32 %s671_s28, %s77_s21 }
  0x2c   :  { %44 = vst.msk [vmem:[#allocation2 + $0x3] sm:$0x1] %vm25_vm0, %v628_v4  ;;  %v630_v5 = vld [vmem:[%s602_s7 + $0x2] sm:$0x1]  ;;  %s606_s4 = scalar_lea.vmem %s1015_s3, %s58_s18  ;;  %s79_s24 = sld [smem:[#allocation4 + %s78_s17]] }
  0x2d   :  { %v632_v6 = vld [vmem:[%s604_s20 + $0x2] sm:$0x1]  ;;  %s608_s16 = scalar_lea.vmem %s1015_s3, %s64_s19  ;;  %50 = vst.msk [vmem:[#allocation2 + $0x4] sm:$0x1] %vm25_vm0, %v630_v5  ;;  %s673_s18 = sadd.s32 128, %s672_s1  ;;  %v459_v5 = vlaneseq }
  0x2e   :  { %56 = vst.msk [vmem:[#allocation2 + $0x5] sm:$0x1] %vm25_vm0, %v632_v6  ;;  %v634_v7 = vld [vmem:[%s606_s4 + $0x2] sm:$0x1]  ;;  %s90_s29 = sand.u32 127, %s867_s9  ;;  %s98_s25 = sshra.s32 %s869_s10, 7 }
  0x2f   :  { %v636_v8 = vld [vmem:[%s608_s16 + $0x2] sm:$0x1]  ;;  %62 = vst.msk [vmem:[#allocation2 + $0x6] sm:$0x1] %vm25_vm0, %v634_v7  ;;  %s91_s19 = sadd.s32 %s673_s18, %s90_s29  ;;  %s674_s26 = sshll.u32 %s98_s25, 7  ;;  %v460_v7 = vshrl.u32 %v459_v5, 7 }
  0x30   :  { %68 = vst.msk [vmem:[#allocation2 + $0x7] sm:$0x1] %vm25_vm0, %v636_v8  ;;  %s92_s27 = sld [smem:[#allocation4 + %s91_s19]]  ;;  %s675_s30 = sadd.s32 128, %s674_s26  ;;  %v556_v6 = vld [vmem:[%s1014_s2 + $0x1] sm:$0x1] }
  0x31   :  { %s103_s5 = sand.u32 127, %s869_s10  ;;  %s111_s6 = sshra.s32 %s871_s11, 7  ;;  %v456_v8 = vld [vmem:[%s1014_s2] sm:$0x1]  ;;  %vm557_vm3 = vcmp.eq.f32.partialorder %v556_v6, 0.0 }
  0x32   :  { %s104_s7 = sadd.s32 %s675_s30, %s103_s5  ;;  %s676_s21 = sshll.u32 %s111_s6, 7  ;;  %vm457_vm4 = vcmp.eq.f32.partialorder %v456_v8, 0.0 }
  0x33   :  { %s610_s8 = scalar_lea.vmem %s1015_s3, %s79_s24  ;;  %s105_s12 = sld [smem:[#allocation4 + %s104_s7]] }
  0x34   :  { %v639_v10 = vld [vmem:[%s610_s8 + $0x2] sm:$0x1]  ;;  %s677_s9 = sadd.s32 128, %s676_s21  ;;  %s116_s20 = sand.u32 127, %s871_s11 }
  0x35   :  { %83 = vst.msk [vmem:[#allocation2 + $0x9] sm:$0x1] %vm25_vm0, %v639_v10  ;;  %s117_s14 = sadd.s32 %s677_s9, %s116_s20  ;;  %s124_s10 = sshra.s32 %s873_s13, 7  ;;  %v822_v10 = vmov 0  }
  0x36   :  { %s612_s22 = scalar_lea.vmem %s1015_s3, %s92_s27  ;;  %s118_s0 = sld [smem:[#allocation4 + %s117_s14]] }
  0x37   :  { %v162_v9 = vld [vmem:[#allocation2] sm:$0xff]  ;;  %s678_s16 = sshll.u32 %s124_s10, 7  ;;  %s129_s17 = sand.u32 127, %s873_s13 }
  0x38   :  { %v177_v11 = vsel %vm176_vm1, %v162_v9, 0.0  ;;  %v642_v12 = vld [vmem:[%s612_s22 + $0x2] sm:$0x1]  ;;  %s679_s1 = sadd.s32 128, %s678_s16  ;;  %s652_s24 = sld [smem:[#allocation5 + $0x85]] }
  0x39   :  { %178 = vadd.xlane.f32.xlu0 %v177_v11  ;;  %96 = vst.msk [vmem:[#allocation2 + $0xa] sm:$0x1] %vm25_vm0, %v642_v12  ;;  %s614_s29 = scalar_lea.vmem %s1015_s3, %s105_s12  ;;  %s130_s25 = sadd.s32 %s679_s1, %s129_s17  ;;  %v558_v11 = vsel %vm557_vm3, 1, %v822_v10  ;;  %v458_v12 = vsel %vm457_vm4, 1, %v822_v10 }
  0x3a   :  { %v645_v13 = vld [vmem:[%s614_s29 + $0x2] sm:$0x1]  ;;  %s131_s19 = sld [smem:[#allocation4 + %s130_s25]]  ;;  %s823_s2 = smov [#allocation6]  }
  0x3b   :  { %s655_s26 = sld [smem:[#allocation5 + $0x86]]  ;;  %109 = vst.msk [vmem:[#allocation2 + $0xb] sm:$0x1] %vm25_vm0, %v645_v13 }
  0x3c   :  { %s616_s5 = scalar_lea.vmem %s1015_s3, %s118_s0 }
  0x3d   :  { %v648_v14 = vld [vmem:[%s616_s5 + $0x2] sm:$0x1] }
  0x3e   :  { %122 = vst.msk [vmem:[#allocation2 + $0xc] sm:$0x1] %vm25_vm0, %v648_v14  ;;  %s137_s13 = sshra.s32 %s652_s24, 7  ;;  %s142_s6 = sand.u32 127, %s652_s24 }
  0x3f   :  { %s680_s7 = sshll.u32 %s137_s13, 7  ;;  %s585_s24 = sshll.u32 %s823_s2, 4  ;;  %s586_s24 = int_to_ptr.vmem [resolvable:$true] %s585_s24 }
  0x40   :  { %s618_s28 = scalar_lea.vmem %s1015_s3, %s131_s19  ;;  %s681_s8 = sadd.s32 128, %s680_s7 }
  0x41   :  { %v651_v15 = vld [vmem:[%s618_s28 + $0x2] sm:$0x1]  ;;  %s143_s12 = sadd.s32 %s681_s8, %s142_s6  ;;  %s150_s9 = sshra.s32 %s655_s26, 7 }
  0x42   :  { %135 = vst.msk [vmem:[#allocation2 + $0xd] sm:$0x1] %vm25_vm0, %v651_v15  ;;  %s144_s20 = sld [smem:[#allocation4 + %s143_s12]]  ;;  %s682_s14 = sshll.u32 %s150_s9, 7 }
  0x43   :  { %s683_s10 = sadd.s32 128, %s682_s14  ;;  %s155_s15 = sand.u32 127, %s655_s26 }
  0x44   :  { %s156_s4 = sadd.s32 %s683_s10, %s155_s15  ;;  %p797_p11 = scmp.lt.s32.totalorder %s586_s24, %s586_s24 }
  0x45   :  { %s157_s22 = sld [smem:[#allocation4 + %s156_s4]] }
  0x48   :  { %s620_s17 = scalar_lea.vmem %s1015_s3, %s144_s20 }
  0x49   :  { %v654_v16 = vld [vmem:[%s620_s17 + $0x2] sm:$0x1] }
  0x4a   :  { %148 = vst.msk [vmem:[#allocation2 + $0xe] sm:$0x1] %vm25_vm0, %v654_v16 }
  0x4b   :  { %s622_s11 = scalar_lea.vmem %s1015_s3, %s157_s22 }
  0x4c   :  { %v657_v17 = vld [vmem:[%s622_s11 + $0x2] sm:$0x1]  ;;  %s792_s11 = scalar_lea.vmem %s586_s24, 256 }
  0x4d   :  { %161 = vst.msk [vmem:[#allocation2 + $0xf] sm:$0x1] %vm25_vm0, %v657_v17  ;;  %p793_p10 = scmp.ne.s32.totalorder %s586_s24, %s792_s11  ;;  %p798_p12 = scmp.lt.s32.totalorder %s792_s11, %s792_s11 }
  0x4f   :  { %p799_p13 = por %p798_p12, %p797_p11 }
  0x51   :  { %p800_p0 = pnand %p799_p13, %p793_p10 }
  0x54   :  { %v163_v18 = vld [vmem:[#allocation2 + $0x8] sm:$0xff] }
  0x55   :  { %v180_v19 = vsel %vm176_vm1, %v163_v18, 0.0 }
  0x56   :  { %181 = vadd.xlane.f32.xlu0 %v180_v19 }
  0xc6   :  { %v179_v20 = vpop.xlane.xlu0 %178 }
  0xc7   :  { %v184_v21 = vmul.f32 0.03125, %v179_v20 }
  0xc9   :  { %v186_v22 = vsub.f32 %v162_v9, %v184_v21  ;;  %v461_v9 = vsub.s32 0, %v460_v7 }
  0xcb   :  { %v188_v23 = vmul.f32 %v186_v22, %v186_v22  ;;  %v562_v13 = vrot.slane %v558_v11, %v461_v9  ;;  %v462_v14 = vrot.slane %v458_v12, %v461_v9 }
  0xcd   :  { %v190_v24 = vsel %vm176_vm1, %v188_v23, 0.0  ;;  %vm563_vm5 = vcmp.eq.s32.totalorder %v562_v13, 1  ;;  %vm463_vm6 = vcmp.eq.s32.totalorder %v462_v14, 1 }
  0xce   :  { %191 = vadd.xlane.f32.xlu1 %v190_v24 }
  0xe3   :  { %v182_v25 = vpop.xlane.xlu0 %181 }
  0xe4   :  { %v185_v26 = vmul.f32 0.03125, %v182_v25 }
  0xe6   :  { %v187_v27 = vsub.f32 %v163_v18, %v185_v26 }
  0xe8   :  { %v189_v28 = vmul.f32 %v187_v27, %v187_v27 }
  0xea   :  { %v193_v29 = vsel %vm176_vm1, %v189_v28, 0.0 }
  0xeb   :  { %194 = vadd.xlane.f32.xlu1 %v193_v29 }
 0x15b   :  { %v192_v42 = vpop.xlane.xlu1 %191 }
 0x15c   :  { %v196_v43 = vmul.f32 0.03125, %v192_v42 }
 0x15e   :  { %v198_v44 = vadd.f32 1e-05, %v196_v43 }
 0x160   :  { %756 = vrsqrt.f32 %v198_v44 }
 0x16a   :  { %v757_v45 = vpop.eup %756 }
 0x16b   :  { %v202_v47 = vmul.f32 %v757_v45, %v186_v22 }
 0x16d   :  { %v208_v49 = vmul.f32 %v658_v46, %v202_v47 }
 0x16f   :  { %v214_v50 = vadd.f32 %v659_v48, %v208_v49 }
 0x171   :  { %708 = vmatprep.mubr.msk.f32.mxu0 %vm176_vm1, %v214_v50  ;;  %719 = vmatprep.mubr.msk.f32.mxu1 %vm176_vm1, %v214_v50 }
 0x178   :  { %v195_v51 = vpop.xlane.xlu1 %194 }
 0x179   :  { %v197_v52 = vmul.f32 0.03125, %v195_v51 }
 0x17b   :  { %v199_v53 = vadd.f32 1e-05, %v197_v52 }
 0x17d   :  { %758 = vrsqrt.f32 %v199_v53 }
 0x187   :  { %v759_v54 = vpop.eup %758 }
 0x188   :  { %v203_v55 = vmul.f32 %v759_v54, %v187_v27 }
 0x18a   :  { %v209_v56 = vmul.f32 %v658_v46, %v203_v55 }
 0x18c   :  { %v215_v57 = vadd.f32 %v659_v48, %v209_v56 }
 0x18e   :  { %709 = vmatmul.mubr.msk.f32.vlgmr.msra.gmra.mrb[0].mxu0 %vm176_vm1, %v215_v57  ;;  %720 = vmatmul.mubr.msk.f32.vlgmr.msra.gmra.mrb[0].mxu1 %vm176_vm1, %v215_v57 }
 0x18f   :  { %729 = vmatprep.mubr.msk.f32.mxu1 %vm821_vm2, %v820_v58  ;;  %724 = vmatprep.mubr.msk.f32.mxu0 %vm821_vm2, %v820_v58 }
 0x261   :  { %v710_v60 = vpop.f32.mrb[0].mxu0  ;;  %v721_v61 = vpop.f32.mrb[0].mxu1 }
 0x262   :  { %v298_v62 = vadd.f32 %v710_v60, %v660_v59  ;;  %v292_v0 = vpop.f32.mrb[1].mxu0  ;;  %v371_v1 = vpop.f32.mrb[1].mxu1  ;;  %v377_v3 = vadd.f32 %v721_v61, %v663_v63 }
 0x263   :  { %v293_v2 = vadd.f32 %v660_v59, %v292_v0  ;;  %v372_v4 = vadd.f32 %v663_v63, %v371_v1 }
 0x264   :  { %728 = vmatpush3.xpose.msk.msra.mxu1 %vm176_vm1, %v298_v62 }
 0x265   :  { %723 = vmatpush3.xpose.msk.msra.mxu0 %vm176_vm1, %v293_v2 }
 0x267   :  { %730 = vmatmul.mubr.msk.f32.vlgmr.msra.gmra.mrb[2].mxu1 %vm176_vm1, %v377_v3 }
 0x268   :  { %725 = vmatmul.mubr.msk.f32.vlgmr.msra.gmra.mrb[2].mxu0 %vm176_vm1, %v372_v4 }
 0x33a   :  { %v552_v15 = vpop.f32.mrb[2].mxu1 }
 0x33b   :  { %v564_v16 = vsel %vm563_vm5, -1e+08, %v552_v15  ;;  %v452_v17 = vpop.f32.mrb[2].mxu0  ;;  %v731_v18 = vpop.f32.mrb[3].mxu1 }
 0x33c   :  { %v464_v19 = vsel %vm463_vm6, -1e+08, %v452_v17  ;;  %v726_v20 = vpop.f32.mrb[3].mxu0  ;;  %v565_v21 = vsel %vm465_vm7, %v564_v16, -inf }
 0x33d   :  { %566 = vmax.xlane.f32.xlu1 %v565_v21  ;;  %v466_v22 = vsel %vm465_vm7, %v464_v19, -inf }
 0x33e   :  { %467 = vmax.xlane.f32.xlu0 %v466_v22 }
 0x3ca   :  { %v567_v23 = vpop.xlane.xlu1 %566 }
 0x3cb   :  { %v568_v24 = vsub.f32 %v564_v16, %v567_v23  ;;  %v468_v25 = vpop.xlane.xlu0 %467 }
 0x3cc   :  { %v469_v26 = vsub.f32 %v464_v19, %v468_v25 }
 0x3cd   :  { %v569_v27 = vmul.f32 1.442695, %v568_v24 }
 0x3ce   :  { %v470_v28 = vmul.f32 1.442695, %v469_v26 }
 0x3cf   :  { %760 = vpow2.f32 %v569_v27 }
 0x3d0   :  { %762 = vpow2.f32 %v470_v28 }
 0x3d9   :  { %v761_v29 = vpop.eup %760 }
 0x3da   :  { %v763_v30 = vpop.eup %762  ;;  %v571_v31 = vsel %vm465_vm7, %v761_v29, 0.0 }
 0x3db   :  { %572 = vadd.xlane.f32.xlu1 %v571_v31  ;;  %v472_v32 = vsel %vm465_vm7, %v763_v30, 0.0 }
 0x3dc   :  { %473 = vadd.xlane.f32.xlu0 %v472_v32 }
 0x468   :  { %v573_v33 = vpop.xlane.xlu1 %572 }
 0x469   :  { %764 = vlog2.f32 %v573_v33  ;;  %v474_v34 = vpop.xlane.xlu0 %473 }
 0x46a   :  { %766 = vlog2.f32 %v474_v34 }
 0x473   :  { %v765_v35 = vpop.eup %764 }
 0x474   :  { %v767_v36 = vpop.eup %766  ;;  %v575_v37 = vmul.f32 0.6931472, %v765_v35 }
 0x475   :  { %v476_v38 = vmul.f32 0.6931472, %v767_v36 }
 0x476   :  { %v576_v39 = vadd.f32 %v575_v37, %v567_v23 }
 0x477   :  { %v477_v40 = vadd.f32 %v476_v38, %v468_v25 }
 0x478   :  { %v577_v41 = vsub.f32 %v564_v16, %v576_v39 }
 0x479   :  { %v478_v42 = vsub.f32 %v464_v19, %v477_v40 }
 0x47a   :  { %579 = vst.msk [vmem:[#allocation6 + $0x8] sm:$0xff] %vm465_vm7, %v577_v41 }
 0x47b   :  { %479 = vst.msk [vmem:[#allocation6] sm:$0xff] %vm465_vm7, %v478_v42 }
 0x47c   :  { %803 = shalt.err (!%p800_p0)
}
 0x47d   :  { %s1020_s25 = sld [smem:[#allocation10_spill]] }
 0x483   :  { %s804_s19 = scalar_lea.hbm %s1020_s25, 256 }
 0x484   :  { %p805_p1 = scmp.ne.s32.totalorder %s1020_s25, %s804_s19  ;;  %p808_p2 = scmp.lt.u32.totalorder %s804_s19, %s1020_s25 }
 0x486   :  { %p810_p3 = pnand %p808_p2, %p805_p1 }
 0x488   :  { %813 = shalt.err (!%p810_p3)
}
 0x489   :  { %s824_s13 = smov 128   ;;  %s825_s6 = smov 8  }
 0x48a   :  { %591 = dma.vmem_to_hbm [thread:$0]  %s586_s24, 256, %s1020_s25, [#allocation7], %s824_s13, %s824_s13, %s825_s6  }
 0x48b   :  { %816 = dma.done.wait [#allocation7], 256  }
 0x48c   :  { %817 = vsyncadd [#allocation7], 4294967040 }
 0x48d   :  { %595 = vsyncpa [#allocation7], 1 }

</bundles_post_ra>
